<compile_context>
chip_gen: v5e
topology: v5e:2x2
jax: 0.10.0
libtpu: 0.0.40
codegen_flags: <defaults>
</compile_context>

<pallas_src>
import math

import jax
import jax.numpy as jnp
from jax.experimental import pallas as pl
from jax.experimental.pallas import tpu as pltpu

# ----- static module "hyperparameters" (deterministic, set in-script) -----
ALPHA = 0.5
IS_VY = True
FUSION_MODE = "hm"     # one of 'rubi' | 'hm' | 'sum'
CONSTANT = 0.0
EPS = 1e-8

# sigmoid(CONSTANT), folded at trace time (Python float).
C_SIG = float(1.0 / (1.0 + math.exp(-CONSTANT)))

# ~512 KiB of f32 per buffered block: 2 inputs + <=4 outputs, double-buffered,
# stays well under the scoped-VMEM default on all of v5e / v6e / v7x.
_TARGET_BLOCK_ELEMS = 128 * 1024


# ------------------------- fused math (CSE'd, static config baked) ----------
def _hm(z):
    return jnp.log(z + EPS) - jnp.log1p(z)


def _fused_math(z_ori, z_v_in, *, want_all, want_nde):
    """Returns (z_vm, z_v_fused, logits_cf, z_nde); unneeded entries are None."""
    if FUSION_MODE == "hm":
        vv = jax.nn.sigmoid(z_v_in) if IS_VY else z_v_in        # sigmoid once
        z_vm = None
        if want_all:
            sm = jax.nn.sigmoid(z_ori)                           # sigmoid once
            z_vm = _hm(sm * vv)
        z_vf = _hm(C_SIG * vv)                                   # sigmoid(const) folded
        logits_cf = z_ori - ALPHA * z_vf
        z_nde = None
        if want_nde:
            vv2 = jax.nn.sigmoid(z_vf) if IS_VY else z_vf
            z_nde = _hm(C_SIG * vv2)
        return z_vm, z_vf, logits_cf, z_nde

    if FUSION_MODE == "rubi":
        sv = jax.nn.sigmoid(z_v_in)
        z_vm = z_ori * sv if want_all else None
        z_vf = CONSTANT * sv
        logits_cf = z_ori - ALPHA * z_vf
        z_nde = CONSTANT * jax.nn.sigmoid(z_vf) if want_nde else None
        return z_vm, z_vf, logits_cf, z_nde

    if FUSION_MODE == "sum":
        def f(z):
            return jnp.log(jax.nn.sigmoid(z) + EPS)
        z_vm = f(z_ori + z_v_in) if want_all else None
        z_vf = f(CONSTANT + z_v_in)
        logits_cf = z_ori - ALPHA * z_vf
        z_nde = f(CONSTANT + z_vf) if want_nde else None
        return z_vm, z_vf, logits_cf, z_nde

    raise ValueError(f"unknown fusion_mode {FUSION_MODE}")


# ------------------------------- kernels ------------------------------------
def _cf_train_kernel(z_ori_ref, z_v_ref, all_ref, cf_ref, v_ref, *maybe_nde_ref):
    z_ori = z_ori_ref[...].astype(jnp.float32)
    z_vin = z_v_ref[...].astype(jnp.float32)
    z_vm, z_vf, logits_cf, z_nde = _fused_math(
        z_ori, z_vin, want_all=True, want_nde=bool(maybe_nde_ref))
    all_ref[...] = z_vm.astype(all_ref.dtype)
    cf_ref[...] = logits_cf.astype(cf_ref.dtype)
    v_ref[...] = z_vf.astype(v_ref.dtype)
    if maybe_nde_ref:
        nde_ref = maybe_nde_ref[0]
        nde_ref[...] = z_nde.astype(nde_ref.dtype)


def _cf_eval_kernel(z_ori_ref, z_v_ref, cf_ref):
    z_ori = z_ori_ref[...].astype(jnp.float32)
    z_vin = z_v_ref[...].astype(jnp.float32)
    _, _, logits_cf, _ = _fused_math(z_ori, z_vin, want_all=False, want_nde=False)
    cf_ref[...] = logits_cf.astype(cf_ref.dtype)


# ------------------------------- wrapper ------------------------------------
def _round_up(x, m):
    return (x + m - 1) // m * m


def counterfactual_forward(z_ori, z_v, mode="train"):
    assert z_ori.shape == z_v.shape and z_ori.dtype == z_v.dtype
    B, N = z_ori.shape
    dtype = z_ori.dtype

    # Lane-dense last dim: pad num_classes to a multiple of 128.
    N_pad = _round_up(N, 128)
    # Batch tile: multiple of 8 sublanes, capped so double-buffered blocks fit
    # the scoped-VMEM default on every TPU generation (incl. v7x's 64 MiB VMEM).
    tb_cap = max(8, (_TARGET_BLOCK_ELEMS // N_pad) // 8 * 8)
    TB = min(_round_up(B, 8), tb_cap)
    B_pad = _round_up(B, TB)
    grid_b = B_pad // TB

    needs_pad = (B_pad, N_pad) != (B, N)
    if needs_pad:
        zo = jnp.zeros((B_pad, N_pad), dtype).at[:B, :N].set(z_ori)
        zv = jnp.zeros((B_pad, N_pad), dtype).at[:B, :N].set(z_v)
    else:
        zo, zv = z_ori, z_v

    spec = pl.BlockSpec((TB, N_pad), lambda i: (i, 0))
    cparams = pltpu.CompilerParams(dimension_semantics=("parallel",))

    def crop(a):
        return a[:B, :N] if needs_pad else a

    if mode == "train":
        n_out = 4 if IS_VY else 3
        outs = pl.pallas_call(
            _cf_train_kernel,
            grid=(grid_b,),
            in_specs=[spec, spec],
            out_specs=[spec] * n_out,
            out_shape=[jax.ShapeDtypeStruct((B_pad, N_pad), dtype)] * n_out,
            compiler_params=cparams,
        )(zo, zv)
        out = {
            "logits_all": crop(outs[0]),
            "logits_vq": z_ori,   # verbatim copy of the input: no kernel writeback
            "logits_cf": crop(outs[1]),
            "logits_v": crop(outs[2]),
        }
        if IS_VY:
            # PyTorch computes z_nde on .clone().detach() inputs -> block grads.
            out["z_nde"] = jax.lax.stop_gradient(crop(outs[3]))
        return out

    # Eval / test mode: slim path, only logits_cf is computed and written.
    cf = pl.pallas_call(
        _cf_eval_kernel,
        grid=(grid_b,),
        in_specs=[spec, spec],
        out_specs=spec,
        out_shape=jax.ShapeDtypeStruct((B_pad, N_pad), dtype),
        compiler_params=cparams,
    )(zo, zv)
    return crop(cf)


# ----- pure-JAX reference (direct translation of the PyTorch module) --------
def _ref_transform(z_v, z_m, v_fact, m_fact):
    if not m_fact:
        z_m = jnp.full_like(z_m, CONSTANT)
    if IS_VY and (not v_fact):
        z_v = jnp.full_like(z_v, CONSTANT)
    if FUSION_MODE == "hm":
        z_m = jax.nn.sigmoid(z_m)
        if IS_VY:
            z_v = jax.nn.sigmoid(z_v)
    return z_v, z_m


def _ref_fusion(z_v, z_m, v_fact, m_fact):
    z_v, z_m = _ref_transform(z_v, z_m, v_fact, m_fact)
    if FUSION_MODE == "rubi":
        z = z_m * jax.nn.sigmoid(z_v)
    elif FUSION_MODE == "hm":
        z = z_m * z_v
        z = jnp.log(z + EPS) - jnp.log1p(z)
    elif FUSION_MODE == "sum":
        z = z_m + z_v
        z = jnp.log(jax.nn.sigmoid(z) + EPS)
    else:
        raise ValueError(f"unknown fusion_mode {FUSION_MODE}")
    return z


def _reference_forward(z_ori, z_v, mode="train"):
    z_vm = _ref_fusion(z_v, z_ori, True, True)
    z_vf = _ref_fusion(z_v, z_ori, True, False)
    logits_cf = z_ori - ALPHA * z_vf
    if mode != "train":
        return logits_cf
    out = {
        "logits_all": z_vm,
        "logits_vq": z_ori,
        "logits_cf": logits_cf,
        "logits_v": z_vf,
    }
    if IS_VY:
        # NOTE: PyTorch rebinds z_v to the fused value before computing z_nde.
        out["z_nde"] = _ref_fusion(z_vf, z_ori, True, False)
    return out


if __name__ == "__main__":
    key = jax.random.PRNGKey(0)
    k1, k2, k3, k4 = jax.random.split(key, 4)

    # Small lane-aligned shape (batch x num_classes).
    B, N = 8, 128
    z_ori = jax.random.normal(k1, (B, N), dtype=jnp.float32)
    z_v = jax.random.normal(k2, (B, N), dtype=jnp.float32)

    out = counterfactual_forward(z_ori, z_v, mode="train")
    jax.block_until_ready(out)
    ref = _reference_forward(z_ori, z_v, mode="train")
    for k in ref:
        assert jnp.allclose(out[k], ref[k], atol=1e-5, rtol=1e-5), k

    # Slim eval path.
    cf_eval = counterfactual_forward(z_ori, z_v, mode="test")
    jax.block_until_ready(cf_eval)
    assert jnp.allclose(cf_eval, ref["logits_cf"], atol=1e-5, rtol=1e-5)

    # Ragged shape exercises the pad-to-lane-dense / crop path.
    B2, N2 = 20, 96
    z_ori2 = jax.random.normal(k3, (B2, N2), dtype=jnp.float32)
    z_v2 = jax.random.normal(k4, (B2, N2), dtype=jnp.float32)
    out2 = counterfactual_forward(z_ori2, z_v2, mode="train")
    jax.block_until_ready(out2)
    ref2 = _reference_forward(z_ori2, z_v2, mode="train")
    for k in ref2:
        assert jnp.allclose(out2[k], ref2[k], atol=1e-5, rtol=1e-5), k

    print("KERNEL_OK")
</pallas_src>

<mosaic_0001>
module attributes {stable_mosaic.version = 11 : i64} {
  func.func @_cf_train_kernel(%arg0: i32, %arg1: memref<8x128xf32, #tpu.memory_space<vmem>>, %arg2: memref<8x128xf32, #tpu.memory_space<vmem>>, %arg3: memref<8x128xf32, #tpu.memory_space<vmem>>, %arg4: memref<8x128xf32, #tpu.memory_space<vmem>>, %arg5: memref<8x128xf32, #tpu.memory_space<vmem>>, %arg6: memref<8x128xf32, #tpu.memory_space<vmem>>) attributes {dimension_semantics = [#tpu.dimension_semantics<parallel>], iteration_bounds = array<i64: 1>, scalar_prefetch = 0 : i64, scratch_operands = 0 : i64, tpu.core_type = #tpu.core_type<tc>, window_params = [{transform_indices = @transform_0, window_bounds = array<i64: 8, 128>}, {transform_indices = @transform_1, window_bounds = array<i64: 8, 128>}, {transform_indices = @transform_2, window_bounds = array<i64: 8, 128>}, {transform_indices = @transform_3, window_bounds = array<i64: 8, 128>}, {transform_indices = @transform_4, window_bounds = array<i64: 8, 128>}, {transform_indices = @transform_5, window_bounds = array<i64: 8, 128>}]} {
    %c0 = arith.constant 0 : index
    %c0_0 = arith.constant 0 : index
    %0 = vector.load %arg1[%c0, %c0_0] : memref<8x128xf32, #tpu.memory_space<vmem>>, vector<8x128xf32>
    %c0_1 = arith.constant 0 : index
    %c0_2 = arith.constant 0 : index
    %1 = vector.load %arg2[%c0_1, %c0_2] : memref<8x128xf32, #tpu.memory_space<vmem>>, vector<8x128xf32>
    %2 = arith.negf %1 : vector<8x128xf32>
    %3 = math.exp %2 : vector<8x128xf32>
    %cst = arith.constant 1.000000e+00 : f32
    %4 = vector.broadcast %cst : f32 to vector<8x128xf32>
    %5 = arith.addf %4, %3 : vector<8x128xf32>
    %6 = arith.divf %4, %5 : vector<8x128xf32>
    %7 = arith.negf %0 : vector<8x128xf32>
    %8 = math.exp %7 : vector<8x128xf32>
    %cst_3 = arith.constant 1.000000e+00 : f32
    %9 = vector.broadcast %cst_3 : f32 to vector<8x128xf32>
    %10 = arith.addf %9, %8 : vector<8x128xf32>
    %11 = arith.divf %9, %10 : vector<8x128xf32>
    %12 = arith.mulf %11, %6 : vector<8x128xf32>
    %cst_4 = arith.constant 9.99999993E-9 : f32
    %13 = vector.broadcast %cst_4 : f32 to vector<8x128xf32>
    %14 = arith.addf %12, %13 : vector<8x128xf32>
    %15 = math.log %14 : vector<8x128xf32>
    %16 = math.log1p %12 : vector<8x128xf32>
    %17 = arith.subf %15, %16 : vector<8x128xf32>
    %cst_5 = arith.constant 5.000000e-01 : f32
    %18 = vector.broadcast %cst_5 : f32 to vector<8x128xf32>
    %19 = arith.mulf %18, %6 : vector<8x128xf32>
    %cst_6 = arith.constant 9.99999993E-9 : f32
    %20 = vector.broadcast %cst_6 : f32 to vector<8x128xf32>
    %21 = arith.addf %19, %20 : vector<8x128xf32>
    %22 = math.log %21 : vector<8x128xf32>
    %23 = math.log1p %19 : vector<8x128xf32>
    %24 = arith.subf %22, %23 : vector<8x128xf32>
    %cst_7 = arith.constant 5.000000e-01 : f32
    %25 = vector.broadcast %cst_7 : f32 to vector<8x128xf32>
    %26 = arith.mulf %25, %24 : vector<8x128xf32>
    %27 = arith.subf %0, %26 : vector<8x128xf32>
    %28 = arith.negf %24 : vector<8x128xf32>
    %29 = math.exp %28 : vector<8x128xf32>
    %cst_8 = arith.constant 1.000000e+00 : f32
    %30 = vector.broadcast %cst_8 : f32 to vector<8x128xf32>
    %31 = arith.addf %30, %29 : vector<8x128xf32>
    %32 = arith.divf %30, %31 : vector<8x128xf32>
    %cst_9 = arith.constant 5.000000e-01 : f32
    %33 = vector.broadcast %cst_9 : f32 to vector<8x128xf32>
    %34 = arith.mulf %33, %32 : vector<8x128xf32>
    %cst_10 = arith.constant 9.99999993E-9 : f32
    %35 = vector.broadcast %cst_10 : f32 to vector<8x128xf32>
    %36 = arith.addf %34, %35 : vector<8x128xf32>
    %37 = math.log %36 : vector<8x128xf32>
    %38 = math.log1p %34 : vector<8x128xf32>
    %39 = arith.subf %37, %38 : vector<8x128xf32>
    %c0_11 = arith.constant 0 : index
    %c0_12 = arith.constant 0 : index
    %40 = vector.load %arg3[%c0_11, %c0_12] : memref<8x128xf32, #tpu.memory_space<vmem>>, vector<8x128xf32>
    tpu.vector_store %arg3[%c0_11, %c0_12], %17 {strides = array<i32>} : memref<8x128xf32, #tpu.memory_space<vmem>>, vector<8x128xf32>,
    %c0_13 = arith.constant 0 : index
    %c0_14 = arith.constant 0 : index
    %41 = vector.load %arg4[%c0_13, %c0_14] : memref<8x128xf32, #tpu.memory_space<vmem>>, vector<8x128xf32>
    tpu.vector_store %arg4[%c0_13, %c0_14], %27 {strides = array<i32>} : memref<8x128xf32, #tpu.memory_space<vmem>>, vector<8x128xf32>,
    %c0_15 = arith.constant 0 : index
    %c0_16 = arith.constant 0 : index
    %42 = vector.load %arg5[%c0_15, %c0_16] : memref<8x128xf32, #tpu.memory_space<vmem>>, vector<8x128xf32>
    tpu.vector_store %arg5[%c0_15, %c0_16], %24 {strides = array<i32>} : memref<8x128xf32, #tpu.memory_space<vmem>>, vector<8x128xf32>,
    %c0_17 = arith.constant 0 : index
    %c0_18 = arith.constant 0 : index
    %43 = vector.load %arg6[%c0_17, %c0_18] : memref<8x128xf32, #tpu.memory_space<vmem>>, vector<8x128xf32>
    tpu.vector_store %arg6[%c0_17, %c0_18], %39 {strides = array<i32>} : memref<8x128xf32, #tpu.memory_space<vmem>>, vector<8x128xf32>,
    return
  }
  func.func @transform_0(%arg0: i32) -> (i32, i32) {
    %c0_i32 = arith.constant 0 : i32
    %c0_i32_0 = arith.constant 0 : i32
    return %arg0, %c0_i32 : i32, i32
  }
  func.func @transform_1(%arg0: i32) -> (i32, i32) {
    %c0_i32 = arith.constant 0 : i32
    %c0_i32_0 = arith.constant 0 : i32
    return %arg0, %c0_i32 : i32, i32
  }
  func.func @transform_2(%arg0: i32) -> (i32, i32) {
    %c0_i32 = arith.constant 0 : i32
    %c0_i32_0 = arith.constant 0 : i32
    return %arg0, %c0_i32 : i32, i32
  }
  func.func @transform_3(%arg0: i32) -> (i32, i32) {
    %c0_i32 = arith.constant 0 : i32
    %c0_i32_0 = arith.constant 0 : i32
    return %arg0, %c0_i32 : i32, i32
  }
  func.func @transform_4(%arg0: i32) -> (i32, i32) {
    %c0_i32 = arith.constant 0 : i32
    %c0_i32_0 = arith.constant 0 : i32
    return %arg0, %c0_i32 : i32, i32
  }
  func.func @transform_5(%arg0: i32) -> (i32, i32) {
    %c0_i32 = arith.constant 0 : i32
    %c0_i32_0 = arith.constant 0 : i32
    return %arg0, %c0_i32 : i32, i32
  }
}

</mosaic_0001>

<bundles_post_ra>
// kernel: tpu_custom_call.1
= control target key start
LH: loop header
LB: loop body
LE: loop exit
PB: predicated region body
PF: predicated region fallthrough
CT: control target
= control target key end

     0   :  { %11 = vsyncpa [#allocation3], 0  ;;  %s466_s0 = inlined_call_operand.hbm [shape: f32[8,128], index: 0, kind: input, shape index: {}]   ;;  %s467_s1 = inlined_call_operand.hbm [shape: f32[8,128], index: 1, kind: input, shape index: {}]   ;;  %s468_s2 = inlined_call_operand.hbm [shape: f32[8,128], index: 2, kind: output, shape index: {0}]   ;;  %s469_s3 = inlined_call_operand.hbm [shape: f32[8,128], index: 3, kind: output, shape index: {1}]   ;;  %s470_s4 = inlined_call_operand.hbm [shape: f32[8,128], index: 4, kind: output, shape index: {2}]   ;;  %s471_s5 = inlined_call_operand.hbm [shape: f32[8,128], index: 5, kind: output, shape index: {3}]  }
   0x1   :  { %12 = vsyncpa [#allocation6], 0 }
   0x2   :  { %13 = vsyncpa [#allocation4], 0 }
   0x3   :  { %14 = vsyncpa [#allocation9], 0 }
   0x4   :  { %15 = vsyncpa [#allocation12], 0  ;;  %s21_s20 = sshll.u32 %s466_s0, 4  ;;  %s405_s21 = smov [#allocation2]   ;;  %s22_s20 = int_to_ptr.hbm [resolvable:$true] %s21_s20 }
   0x5   :  { %s23_s22 = sshll.u32 %s405_s21, 4  ;;  %s32_s25 = sshll.u32 %s467_s1, 4  ;;  %s24_s22 = int_to_ptr.vmem [resolvable:$true] %s23_s22  ;;  %s33_s25 = int_to_ptr.hbm [resolvable:$true] %s32_s25 }
   0x6   :  { %26 = dma.hbm_to_vmem [thread:$0]  %s22_s20, 128, %s24_s22, [#allocation3]  }
   0x7   :  { %s406_s26 = smov [#allocation5]  }
   0x8   :  { %s34_s27 = sshll.u32 %s406_s26, 4  ;;  %s35_s27 = int_to_ptr.vmem [resolvable:$true] %s34_s27 }
   0x9   :  { %37 = dma.hbm_to_vmem [thread:$0]  %s33_s25, 128, %s35_s27, [#allocation6]  }
   0xa   :  { %395 = dma.done.wait [#allocation3], 128  }
   0xb   :  { %396 = vsyncadd [#allocation3], 4294967168 }
   0xc   :  { %397 = dma.done.wait [#allocation6], 128  }
   0xd   :  { %398 = vsyncadd [#allocation6], 4294967168  ;;  %v447_v0 = vld [vmem:[#allocation2] sm:$0xff]  ;;  %v47_v1 = vld [vmem:[#allocation5] sm:$0xff]  ;;  %s407_s0 = smov [#allocation8]   ;;  %s171_s30 = sshll.u32 %s469_s3, 4  ;;  %s172_s30 = int_to_ptr.hbm [resolvable:$true] %s171_s30 }
   0xe   :  { %v218_v2 = vmul.f32 -1.442695, %v47_v1  ;;  %v219_v3 = vmul.f32 -1.442695, %v447_v0  ;;  %s450_s1 = sshll.u32 %s407_s0, 4  ;;  %s408_s6 = smov [#allocation10]   ;;  %s170_s1 = int_to_ptr.vmem [resolvable:$true] %s450_s1 }
   0xf   :  { %s180_s7 = sshll.u32 %s408_s6, 4  ;;  %s182_s10 = sshll.u32 %s470_s4, 4  ;;  %s181_s7 = int_to_ptr.vmem [resolvable:$true] %s180_s7  ;;  %s183_s10 = int_to_ptr.hbm [resolvable:$true] %s182_s10 }
  0x10   :  { %227 = vpow2.f32 %v218_v2  ;;  %s409_s11 = smov [#allocation7]   ;;  %s160_s3 = sshll.u32 %s468_s2, 4  ;;  %s161_s3 = int_to_ptr.hbm [resolvable:$true] %s160_s3 }
  0x11   :  { %229 = vpow2.f32 %v219_v3  ;;  %s158_s12 = sshll.u32 %s409_s11, 4  ;;  %s410_s2 = smov [#allocation11]   ;;  %s159_s12 = int_to_ptr.vmem [resolvable:$true] %s158_s12 }
  0x12   :  { %s191_s4 = sshll.u32 %s410_s2, 4  ;;  %s193_s17 = sshll.u32 %s471_s5, 4  ;;  %s192_s4 = int_to_ptr.vmem [resolvable:$true] %s191_s4  ;;  %s194_s17 = int_to_ptr.hbm [resolvable:$true] %s193_s17 }
  0x16   :  { %v228_v4 = vpop.eup %227 }
  0x17   :  { %v230_v5 = vpop.eup %229  ;;  %v51_v6 = vadd.f32 1.0, %v228_v4 }
  0x18   :  { %v70_v7 = vadd.f32 1.0, %v230_v5 }
  0x19   :  { %231 = vrcp.f32 %v51_v6  ;;  %v63_v11 = vand.u32 2147483648, %v51_v6  ;;  %vm57_vm0 = vweird.f32 %v51_v6  ;;  %v61_v14 = vand.u32 2147483647, %v51_v6 }
  0x1a   :  { %233 = vrcp.f32 %v70_v7  ;;  %v82_v21 = vand.u32 2147483648, %v70_v7  ;;  %vm76_vm4 = vweird.f32 %v70_v7  ;;  %v80_v23 = vand.u32 2147483647, %v70_v7 }
  0x1b   :  { %v64_v17 = vor.u32 1.1754944e-38, %v63_v11  ;;  %vm62_vm3 = vcmp.eq.f32.partialorder %v61_v14, 8.507059e+37 }
  0x1c   :  { %v83_v26 = vor.u32 1.1754944e-38, %v82_v21  ;;  %vm81_vm7 = vcmp.eq.f32.partialorder %v80_v23, 8.507059e+37 }
  0x1f   :  { %v232_v8 = vpop.eup %231 }
  0x20   :  { %v234_v9 = vpop.eup %233  ;;  %v53_v10 = vmul.f32 %v232_v8, %v51_v6  ;;  %vm58_vm1 = vweird.f32 %v232_v8 }
  0x21   :  { %v72_v12 = vmul.f32 %v234_v9, %v70_v7  ;;  %vm59_vm2 = vmor %vm57_vm0, %vm58_vm1  ;;  %vm77_vm5 = vweird.f32 %v234_v9 }
  0x22   :  { %v54_v13 = vsub.f32 1.0, %v53_v10  ;;  %vm78_vm6 = vmor %vm76_vm4, %vm77_vm5 }
  0x23   :  { %v73_v15 = vsub.f32 1.0, %v72_v12 }
  0x24   :  { %v55_v16 = vmul.f32 %v232_v8, %v54_v13 }
  0x25   :  { %v74_v19 = vmul.f32 %v234_v9, %v73_v15 }
  0x26   :  { %v56_v18 = vadd.f32 %v232_v8, %v55_v16 }
  0x27   :  { %v75_v25 = vadd.f32 %v234_v9, %v74_v19 }
  0x28   :  { %v60_v20 = vsel %vm59_vm2, %v232_v8, %v56_v18 }
  0x29   :  { %v65_v22 = vsel %vm62_vm3, %v64_v17, %v60_v20  ;;  %v79_v30 = vsel %vm78_vm6, %v234_v9, %v75_v25 }
  0x2a   :  { %v100_v24 = vmul.f32 0.5, %v65_v22  ;;  %v84_v32 = vsel %vm81_vm7, %v83_v26, %v79_v30 }
  0x2b   :  { %v86_v34 = vmul.f32 %v84_v32, %v65_v22 }
  0x2c   :  { %v101_v27 = vadd.f32 1e-08, %v100_v24  ;;  %v104_v28 = vadd.f32 1.0, %v100_v24  ;;  %v107_v29 = vmul.f32 -0.5, %v100_v24  ;;  %v110_v33 = vand.u32 2147483647, %v100_v24 }
  0x2d   :  { %v87_v35 = vadd.f32 1e-08, %v86_v34  ;;  %v90_v36 = vadd.f32 1.0, %v86_v34  ;;  %v93_v37 = vmul.f32 -0.5, %v86_v34  ;;  %v96_v45 = vand.u32 2147483647, %v86_v34 }
  0x2e   :  { %235 = vlog2.f32 %v101_v27  ;;  %v108_v31 = vadd.f32 1.0, %v107_v29  ;;  %vm111_vm8 = vcmp.lt.f32.partialorder %v110_v33, 0.0004427343 }
  0x2f   :  { %237 = vlog2.f32 %v104_v28  ;;  %v94_v43 = vadd.f32 1.0, %v93_v37  ;;  %vm97_vm9 = vcmp.lt.f32.partialorder %v96_v45, 0.0004427343 }
  0x30   :  { %v109_v39 = vmul.f32 %v108_v31, %v100_v24  ;;  %239 = vlog2.f32 %v87_v35 }
  0x31   :  { %241 = vlog2.f32 %v90_v36  ;;  %v95_v50 = vmul.f32 %v94_v43, %v86_v34 }
  0x34   :  { %v236_v38 = vpop.eup %235 }
  0x35   :  { %v238_v40 = vpop.eup %237  ;;  %v103_v41 = vmul.f32 0.6931472, %v236_v38 }
  0x36   :  { %v106_v42 = vmul.f32 0.6931472, %v238_v40  ;;  %v240_v47 = vpop.eup %239 }
  0x37   :  { %v242_v51 = vpop.eup %241  ;;  %v89_v52 = vmul.f32 0.6931472, %v240_v47 }
  0x38   :  { %v112_v44 = vsel %vm111_vm8, %v109_v39, %v106_v42  ;;  %v92_v54 = vmul.f32 0.6931472, %v242_v51 }
  0x39   :  { %v113_v46 = vsub.f32 %v103_v41, %v112_v44 }
  0x3a   :  { %v98_v55 = vsel %vm97_vm9, %v95_v50, %v92_v54 }
  0x3b   :  { %v114_v48 = vmul.f32 0.5, %v113_v46  ;;  %v220_v49 = vmul.f32 -1.442695, %v113_v46  ;;  %151 = vst [vmem:[#allocation10] sm:$0xff] %v113_v46  ;;  %v99_v56 = vsub.f32 %v89_v52, %v98_v55 }
  0x3d   :  { %v115_v53 = vsub.f32 %v447_v0, %v114_v48  ;;  %243 = vpow2.f32 %v220_v49  ;;  %149 = vst [vmem:[#allocation7] sm:$0xff] %v99_v56 }
  0x3e   :  { %163 = dma.vmem_to_hbm [thread:$0]  %s159_s12, 128, %s161_s3, [#allocation4]  }
  0x3f   :  { %150 = vst [vmem:[#allocation8] sm:$0xff] %v115_v53 }
  0x40   :  { %174 = dma.vmem_to_hbm [thread:$0]  %s170_s1, 128, %s172_s30, [#allocation9]  }
  0x41   :  { %185 = dma.vmem_to_hbm [thread:$0]  %s181_s7, 128, %s183_s10, [#allocation9]  }
  0x43   :  { %v244_v57 = vpop.eup %243 }
  0x44   :  { %v119_v58 = vadd.f32 1.0, %v244_v57 }
  0x46   :  { %245 = vrcp.f32 %v119_v58  ;;  %v131_v61 = vand.u32 2147483648, %v119_v58  ;;  %vm125_vm10 = vweird.f32 %v119_v58  ;;  %v129_v63 = vand.u32 2147483647, %v119_v58 }
  0x48   :  { %v132_v1 = vor.u32 1.1754944e-38, %v131_v61  ;;  %vm130_vm13 = vcmp.eq.f32.partialorder %v129_v63, 8.507059e+37 }
  0x4c   :  { %v246_v59 = vpop.eup %245 }
  0x4d   :  { %v121_v60 = vmul.f32 %v246_v59, %v119_v58  ;;  %vm126_vm11 = vweird.f32 %v246_v59 }
  0x4e   :  { %vm127_vm12 = vmor %vm125_vm10, %vm126_vm11 }
  0x4f   :  { %v122_v62 = vsub.f32 1.0, %v121_v60 }
  0x51   :  { %v123_v0 = vmul.f32 %v246_v59, %v122_v62 }
  0x53   :  { %v124_v2 = vadd.f32 %v246_v59, %v123_v0 }
  0x55   :  { %v128_v3 = vsel %vm127_vm12, %v246_v59, %v124_v2 }
  0x56   :  { %v133_v4 = vsel %vm130_vm13, %v132_v1, %v128_v3 }
  0x57   :  { %v135_v5 = vmul.f32 0.5, %v133_v4 }
  0x59   :  { %v136_v6 = vadd.f32 1e-08, %v135_v5  ;;  %v139_v7 = vadd.f32 1.0, %v135_v5  ;;  %v142_v8 = vmul.f32 -0.5, %v135_v5  ;;  %v145_v10 = vand.u32 2147483647, %v135_v5 }
  0x5b   :  { %247 = vlog2.f32 %v136_v6  ;;  %v143_v9 = vadd.f32 1.0, %v142_v8  ;;  %vm146_vm14 = vcmp.lt.f32.partialorder %v145_v10, 0.0004427343 }
  0x5c   :  { %249 = vlog2.f32 %v139_v7 }
  0x5d   :  { %v144_v12 = vmul.f32 %v143_v9, %v135_v5 }
  0x61   :  { %v248_v11 = vpop.eup %247 }
  0x62   :  { %v250_v13 = vpop.eup %249  ;;  %v138_v14 = vmul.f32 0.6931472, %v248_v11 }
  0x63   :  { %v141_v15 = vmul.f32 0.6931472, %v250_v13 }
  0x65   :  { %v147_v16 = vsel %vm146_vm14, %v144_v12, %v141_v15 }
  0x66   :  { %v148_v17 = vsub.f32 %v138_v14, %v147_v16 }
  0x68   :  { %152 = vst [vmem:[#allocation11] sm:$0xff] %v148_v17 }
  0x69   :  { %196 = dma.vmem_to_hbm [thread:$0]  %s192_s4, 128, %s194_s17, [#allocation12]  }
  0x6a   :  { %399 = dma.done.wait [#allocation4], 128  }
  0x6b   :  { %400 = vsyncadd [#allocation4], 4294967168 }
  0x6c   :  { %401 = dma.done.wait [#allocation9], 256  }
  0x6d   :  { %402 = vsyncadd [#allocation9], 4294967040 }
  0x6e   :  { %403 = dma.done.wait [#allocation12], 128  }
  0x6f   :  { %404 = vsyncadd [#allocation12], 4294967168 }
  0x70   :  { %213 = vsyncpa [#allocation3], 1 }
  0x71   :  { %214 = vsyncpa [#allocation6], 1 }
  0x72   :  { %215 = vsyncpa [#allocation4], 1 }
  0x73   :  { %216 = vsyncpa [#allocation9], 1 }
  0x74   :  { %217 = vsyncpa [#allocation12], 1 }

</bundles_post_ra>
